<compile_context>
chip_gen: v7x
topology: tpu7x:2x2x1
jax: 0.10.0
libtpu: 0.0.40
codegen_flags: <defaults>
</compile_context>

<pallas_src>
import jax
import jax.numpy as jnp
from jax.experimental import pallas as pl
from jax.experimental.pallas import tpu as pltpu


LANE = 128          # lane width / padded feature dim
TM = 256            # row tile of the propagation matmul (multiple of 256 for v6e MXU)
TK = 256            # reduction tile of the propagation matmul
VMEM_LIMIT = 48 * 1024 * 1024   # fits v7x's 64 MiB physical VMEM with headroom


def _round_up(x, m):
    return ((x + m - 1) // m) * m


def _pad2(a, rows, cols):
    """Zero-pad a 2-D array to (rows, cols)."""
    return jnp.zeros((rows, cols), a.dtype).at[: a.shape[0], : a.shape[1]].set(a)


# ----------------------------------------------------------------------------
# Kernel 1: one GCNConv layer  out = relu((Ahat @ Xin) @ W + b)
#   grid = (N_pad // TM, N_pad // TK); k (reduction) is the last grid axis.
# ----------------------------------------------------------------------------
def _gcn_conv_kernel(ahat_ref,   # (TM, TK)        bf16 tile of Ahat
                     xin_ref,    # (N_pad, Cin)    f32, resident (constant index)
                     w_ref,      # (Cin, Cout)     bf16, resident
                     b_ref,      # (1, Cout)       f32, resident
                     out_ref,    # (TM, Cout)      f32 output tile (resident over k)
                     acc_ref):   # (TM, Cin)       f32 scratch accumulator
    k = pl.program_id(1)

    @pl.when(k == 0)
    def _init():
        acc_ref[...] = jnp.zeros_like(acc_ref)

    tk = ahat_ref.shape[1]
    row0 = pl.multiple_of(k * tk, tk)
    xin_blk = xin_ref[pl.ds(row0, tk), :].astype(jnp.bfloat16)
    acc_ref[...] += jnp.dot(ahat_ref[...], xin_blk,
                            preferred_element_type=jnp.float32)

    @pl.when(k == pl.num_programs(1) - 1)
    def _finalize():
        h = jnp.dot(acc_ref[...].astype(jnp.bfloat16), w_ref[...],
                    preferred_element_type=jnp.float32) + b_ref[...]
        out_ref[...] = jnp.maximum(h, 0.0)


def _gcn_conv(ahat_p, xin_p, w_p, b_p):
    n_pad = ahat_p.shape[0]
    cin = xin_p.shape[1]
    cout = w_p.shape[1]
    grid = (n_pad // TM, n_pad // TK)

    flops = 2 * n_pad * n_pad * cin + 2 * n_pad * cin * cout
    bytes_accessed = (ahat_p.size * 2 + xin_p.size * 4 + w_p.size * 2
                      + b_p.size * 4 + n_pad * cout * 4)

    return pl.pallas_call(
        _gcn_conv_kernel,
        out_shape=jax.ShapeDtypeStruct((n_pad, cout), jnp.float32),
        grid_spec=pltpu.PrefetchScalarGridSpec(
            num_scalar_prefetch=0,
            grid=grid,
            in_specs=[
                pl.BlockSpec((TM, TK), lambda i, k: (i, k)),        # Ahat tile
                pl.BlockSpec((n_pad, cin), lambda i, k: (0, 0)),    # Xin resident
                pl.BlockSpec((cin, cout), lambda i, k: (0, 0)),     # W resident
                pl.BlockSpec((1, cout), lambda i, k: (0, 0)),       # b resident
            ],
            out_specs=pl.BlockSpec((TM, cout), lambda i, k: (i, 0)),
            scratch_shapes=[pltpu.VMEM((TM, cin), jnp.float32)],
        ),
        compiler_params=pltpu.CompilerParams(
            dimension_semantics=("parallel", "arbitrary"),
            vmem_limit_bytes=VMEM_LIMIT,
        ),
        cost_estimate=pl.CostEstimate(flops=flops, transcendentals=0,
                                      bytes_accessed=bytes_accessed),
    )(ahat_p, xin_p, w_p, b_p)


# ----------------------------------------------------------------------------
# Kernel 2: pooled = Pool @ H2 ; z = relu([pooled | add] @ Wfc1 + b) ; out = z @ Wfc2 + b
#   grid = (N_pad // TK,) over the pooling reduction.  Output is a lane-dense
#   (B_pad, 128) slab; the wrapper slices the real (B, 2) logits.
# ----------------------------------------------------------------------------
def _gnn_head_kernel(pool_ref,   # (B_pad, TK)     bf16 tile of pooling matrix
                     h_ref,      # (TK, H_pad)     f32 tile of node activations
                     add_ref,    # (B_pad, A_pad)  bf16, resident
                     wp_ref,     # (H_pad, H_pad)  bf16, resident (fc1 rows: pooled)
                     wa_ref,     # (A_pad, H_pad)  bf16, resident (fc1 rows: additional)
                     bf1_ref,    # (1, H_pad)      f32, resident
                     wf2_ref,    # (H_pad, O_pad)  bf16, resident
                     bf2_ref,    # (1, O_pad)      f32, resident
                     out_ref,    # (B_pad, O_pad)  f32
                     acc_ref):   # (B_pad, H_pad)  f32 scratch (pooled accumulator)
    k = pl.program_id(0)

    @pl.when(k == 0)
    def _init():
        acc_ref[...] = jnp.zeros_like(acc_ref)

    acc_ref[...] += jnp.dot(pool_ref[...], h_ref[...].astype(jnp.bfloat16),
                            preferred_element_type=jnp.float32)

    @pl.when(k == pl.num_programs(0) - 1)
    def _finalize():
        pooled = acc_ref[...].astype(jnp.bfloat16)
        z = (jnp.dot(pooled, wp_ref[...], preferred_element_type=jnp.float32)
             + jnp.dot(add_ref[...], wa_ref[...], preferred_element_type=jnp.float32)
             + bf1_ref[...])
        z = jnp.maximum(z, 0.0).astype(jnp.bfloat16)
        out_ref[...] = (jnp.dot(z, wf2_ref[...], preferred_element_type=jnp.float32)
                        + bf2_ref[...])


def _gnn_head(pool_p, h_p, add_p, wp_p, wa_p, bf1_p, wf2_p, bf2_p):
    b_pad, n_pad = pool_p.shape
    h_dim = h_p.shape[1]
    a_dim = add_p.shape[1]
    o_dim = wf2_p.shape[1]
    grid = (n_pad // TK,)

    flops = (2 * b_pad * n_pad * h_dim + 2 * b_pad * h_dim * h_dim
             + 2 * b_pad * a_dim * h_dim + 2 * b_pad * h_dim * o_dim)
    bytes_accessed = (pool_p.size * 2 + h_p.size * 4 + add_p.size * 2
                      + wp_p.size * 2 + wa_p.size * 2 + wf2_p.size * 2
                      + bf1_p.size * 4 + bf2_p.size * 4 + b_pad * o_dim * 4)

    return pl.pallas_call(
        _gnn_head_kernel,
        out_shape=jax.ShapeDtypeStruct((b_pad, o_dim), jnp.float32),
        grid_spec=pltpu.PrefetchScalarGridSpec(
            num_scalar_prefetch=0,
            grid=grid,
            in_specs=[
                pl.BlockSpec((b_pad, TK), lambda k: (0, k)),     # pooling tile
                pl.BlockSpec((TK, h_dim), lambda k: (k, 0)),     # activations tile
                pl.BlockSpec((b_pad, a_dim), lambda k: (0, 0)),  # additional feats
                pl.BlockSpec((h_dim, h_dim), lambda k: (0, 0)),  # wp
                pl.BlockSpec((a_dim, h_dim), lambda k: (0, 0)),  # wa
                pl.BlockSpec((1, h_dim), lambda k: (0, 0)),      # bf1
                pl.BlockSpec((h_dim, o_dim), lambda k: (0, 0)),  # wf2
                pl.BlockSpec((1, o_dim), lambda k: (0, 0)),      # bf2
            ],
            out_specs=pl.BlockSpec((b_pad, o_dim), lambda k: (0, 0)),
            scratch_shapes=[pltpu.VMEM((b_pad, h_dim), jnp.float32)],
        ),
        compiler_params=pltpu.CompilerParams(
            dimension_semantics=("arbitrary",),
            vmem_limit_bytes=VMEM_LIMIT,
        ),
        cost_estimate=pl.CostEstimate(flops=flops, transcendentals=0,
                                      bytes_accessed=bytes_accessed),
    )(pool_p, h_p, add_p, wp_p, wa_p, bf1_p, wf2_p, bf2_p)


# ----------------------------------------------------------------------------
# Forward wrapper: pad / cast, run the three pallas_calls, slice real logits.
# ----------------------------------------------------------------------------
def gnn_forward_pallas(x, ahat, pool_mat, add_feats, params):
    (w1, b1, w2, b2, wp, wa, bf1, wf2, bf2) = params
    n, f = x.shape
    b, a = add_feats.shape
    h = w1.shape[1]
    out_dim = wf2.shape[1]

    n_pad = _round_up(n, max(TM, TK))
    b_pad = _round_up(b, 8)
    f_pad = _round_up(f, LANE)
    h_pad = _round_up(h, LANE)
    a_pad = _round_up(a, LANE)
    o_pad = _round_up(out_dim, LANE)

    # Heavy operands -> bf16 MXU feeds; activations & biases stay f32.
    ahat_p = _pad2(ahat, n_pad, n_pad).astype(jnp.bfloat16)
    x_p = _pad2(x, n_pad, f_pad)
    pool_p = _pad2(pool_mat, b_pad, n_pad).astype(jnp.bfloat16)
    add_p = _pad2(add_feats, b_pad, a_pad).astype(jnp.bfloat16)

    w1_p = _pad2(w1, f_pad, h_pad).astype(jnp.bfloat16)
    w2_p = _pad2(w2, h_pad, h_pad).astype(jnp.bfloat16)
    wp_p = _pad2(wp, h_pad, h_pad).astype(jnp.bfloat16)
    wa_p = _pad2(wa, a_pad, h_pad).astype(jnp.bfloat16)
    wf2_p = _pad2(wf2, h_pad, o_pad).astype(jnp.bfloat16)
    b1_p = _pad2(b1, 1, h_pad)
    b2_p = _pad2(b2, 1, h_pad)
    bf1_p = _pad2(bf1, 1, h_pad)
    bf2_p = _pad2(bf2, 1, o_pad)

    h1 = _gcn_conv(ahat_p, x_p, w1_p, b1_p)     # (n_pad, h_pad) f32
    h2 = _gcn_conv(ahat_p, h1, w2_p, b2_p)      # (n_pad, h_pad) f32
    # dropout(training=False) is identity (eval mode)
    out_p = _gnn_head(pool_p, h2, add_p, wp_p, wa_p, bf1_p, wf2_p, bf2_p)
    return out_p[:b, :out_dim]                  # lane-dense slab -> real logits


# ----------------------------------------------------------------------------
# Glue: graph preprocessing + deterministic parameter init + pure-JAX reference
# ----------------------------------------------------------------------------
def build_gcn_norm_adj(edge_index, num_nodes):
    """Dense symmetric-normalized adjacency with self loops (PyG GCNConv norm)."""
    src, dst = edge_index[0], edge_index[1]
    adj = jnp.zeros((num_nodes, num_nodes), jnp.float32)
    adj = adj.at[dst, src].add(1.0)                         # messages src -> dst
    adj = adj + jnp.eye(num_nodes, dtype=jnp.float32)       # self loops
    deg = jnp.sum(adj, axis=1)
    dinv = jnp.where(deg > 0, 1.0 / jnp.sqrt(deg), 0.0)
    return dinv[:, None] * adj * dinv[None, :]


def build_mean_pool_matrix(batch, num_graphs):
    onehot = (batch[None, :] == jnp.arange(num_graphs)[:, None]).astype(jnp.float32)
    counts = jnp.maximum(jnp.sum(onehot, axis=1, keepdims=True), 1.0)
    return onehot / counts


def init_params(key, num_node_features, num_additional_features, hidden):
    ks = jax.random.split(key, 8)
    s = 0.1
    w1 = s * jax.random.normal(ks[0], (num_node_features, hidden), jnp.float32)
    b1 = s * jax.random.normal(ks[1], (1, hidden), jnp.float32)
    w2 = s * jax.random.normal(ks[2], (hidden, hidden), jnp.float32)
    b2 = s * jax.random.normal(ks[3], (1, hidden), jnp.float32)
    wfc1_t = s * jax.random.normal(ks[4], (hidden + num_additional_features, hidden),
                                   jnp.float32)
    wp, wa = wfc1_t[:hidden, :], wfc1_t[hidden:, :]
    bf1 = s * jax.random.normal(ks[5], (1, hidden), jnp.float32)
    wf2 = s * jax.random.normal(ks[6], (hidden, 2), jnp.float32)
    bf2 = s * jax.random.normal(ks[7], (1, 2), jnp.float32)
    return (w1, b1, w2, b2, wp, wa, bf1, wf2, bf2)


def gnn_forward_ref(x, ahat, pool_mat, add_feats, params):
    """Pure-f32 JAX reference matching the PyTorch forward (eval mode)."""
    (w1, b1, w2, b2, wp, wa, bf1, wf2, bf2) = params
    h = jax.nn.relu(ahat @ (x @ w1) + b1)
    h = jax.nn.relu(ahat @ (h @ w2) + b2)
    pooled = pool_mat @ h
    z = jax.nn.relu(pooled @ wp + add_feats @ wa + bf1)
    return z @ wf2 + bf2


if __name__ == "__main__":
    # Small deterministic problem: 2 graphs of 8 nodes each (ring topology).
    NUM_NODES = 16
    NUM_NODE_FEATURES = 8
    NUM_ADDITIONAL_FEATURES = 4
    HIDDEN = 32
    NUM_GRAPHS = 2

    key = jax.random.PRNGKey(0)
    k_x, k_add, k_par = jax.random.split(key, 3)

    x = jax.random.normal(k_x, (NUM_NODES, NUM_NODE_FEATURES), jnp.float32)
    additional_features = jax.random.normal(
        k_add, (NUM_GRAPHS, NUM_ADDITIONAL_FEATURES), jnp.float32)

    # edge_index: ring within each 8-node graph, both directions (undirected).
    edges = []
    for g in range(NUM_GRAPHS):
        base = g * 8
        for i in range(8):
            a_, b_ = base + i, base + (i + 1) % 8
            edges.append((a_, b_))
            edges.append((b_, a_))
    edge_index = jnp.array(edges, dtype=jnp.int32).T          # (2, E)
    batch = jnp.repeat(jnp.arange(NUM_GRAPHS, dtype=jnp.int32), 8)

    ahat = build_gcn_norm_adj(edge_index, NUM_NODES)
    pool_mat = build_mean_pool_matrix(batch, NUM_GRAPHS)
    params = init_params(k_par, NUM_NODE_FEATURES, NUM_ADDITIONAL_FEATURES, HIDDEN)

    out = gnn_forward_pallas(x, ahat, pool_mat, additional_features, params)
    out = jax.block_until_ready(out)

    ref = gnn_forward_ref(x, ahat, pool_mat, additional_features, params)
    assert out.shape == (NUM_GRAPHS, 2)
    # bf16 MXU operands (f32 accumulation) -> slightly looser tolerance than pure f32.
    assert jnp.allclose(out, ref, atol=2e-2, rtol=2e-2), (
        f"max abs diff = {float(jnp.max(jnp.abs(out - ref)))}")

    print("KERNEL_OK")
</pallas_src>

<mosaic_0001>
module attributes {stable_mosaic.version = 11 : i64} {
  func.func @_gcn_conv_kernel(%arg0: i32, %arg1: i32, %arg2: memref<256x256xbf16, #tpu.memory_space<vmem>>, %arg3: memref<256x128xf32, #tpu.memory_space<vmem>>, %arg4: memref<128x128xbf16, #tpu.memory_space<vmem>>, %arg5: memref<1x128xf32, #tpu.memory_space<vmem>>, %arg6: memref<256x128xf32, #tpu.memory_space<vmem>>, %arg7: memref<256x128xf32, #tpu.memory_space<vmem>>) attributes {dimension_semantics = [#tpu.dimension_semantics<parallel>, #tpu.dimension_semantics<arbitrary>], iteration_bounds = array<i64: 1, 1>, scalar_prefetch = 0 : i64, scratch_operands = 1 : i64, tpu.core_type = #tpu.core_type<tc>, window_params = [{transform_indices = @transform_0, window_bounds = array<i64: 256, 256>}, {pipeline_mode = #tpu.pipeline_mode<synchronous>, transform_indices = @transform_1, window_bounds = array<i64: 256, 128>}, {pipeline_mode = #tpu.pipeline_mode<synchronous>, transform_indices = @transform_2, window_bounds = array<i64: 128, 128>}, {pipeline_mode = #tpu.pipeline_mode<synchronous>, transform_indices = @transform_3, window_bounds = array<i64: 1, 128>}, {transform_indices = @transform_4, window_bounds = array<i64: 256, 128>}]} {
    %c0_i32 = arith.constant 0 : i32
    %0 = arith.cmpi eq, %arg1, %c0_i32 : i32
    %1 = arith.extui %0 : i1 to i32
    %c0_i32_0 = arith.constant 0 : i32
    %2 = arith.cmpi ne, %1, %c0_i32_0 : i32
    scf.if %2 {
      %cst_9 = arith.constant 0.000000e+00 : f32
      %16 = vector.broadcast %cst_9 : f32 to vector<256x128xf32>
      %c0_10 = arith.constant 0 : index
      %c0_11 = arith.constant 0 : index
      %17 = vector.load %arg7[%c0_10, %c0_11] : memref<256x128xf32, #tpu.memory_space<vmem>>, vector<256x128xf32>
      tpu.vector_store %arg7[%c0_10, %c0_11], %16 {strides = array<i32>} : memref<256x128xf32, #tpu.memory_space<vmem>>, vector<256x128xf32>,
    } else {
    }
    %c256_i32 = arith.constant 256 : i32
    %3 = arith.muli %arg1, %c256_i32 : i32
    %4 = tpu.assume_multiple %3, 256 : i32
    %5 = arith.index_cast %4 : i32 to index
    %c0 = arith.constant 0 : index
    %6 = vector.load %arg3[%5, %c0] : memref<256x128xf32, #tpu.memory_space<vmem>>, vector<256x128xf32>
    %7 = arith.truncf %6 : vector<256x128xf32> to vector<256x128xbf16>
    %c0_1 = arith.constant 0 : index
    %c0_2 = arith.constant 0 : index
    %8 = vector.load %arg7[%c0_1, %c0_2] : memref<256x128xf32, #tpu.memory_space<vmem>>, vector<256x128xf32>
    %c0_3 = arith.constant 0 : index
    %c0_4 = arith.constant 0 : index
    %9 = vector.load %arg2[%c0_3, %c0_4] : memref<256x256xbf16, #tpu.memory_space<vmem>>, vector<256x256xbf16>
    %cst = arith.constant dense<0.000000e+00> : vector<256x128xf32>
    %10 = tpu.matmul %9, %7, %cst {dimension_numbers = #tpu.dot_dimension_numbers<[1], [0], [0], [1], [0, 0, 1, 1], [], []>} : vector<256x256xbf16>, vector<256x128xbf16>, vector<256x128xf32> -> vector<256x128xf32>
    %11 = arith.addf %8, %10 : vector<256x128xf32>
    %c0_5 = arith.constant 0 : index
    %c0_6 = arith.constant 0 : index
    %12 = vector.load %arg7[%c0_5, %c0_6] : memref<256x128xf32, #tpu.memory_space<vmem>>, vector<256x128xf32>
    tpu.vector_store %arg7[%c0_5, %c0_6], %11 {strides = array<i32>} : memref<256x128xf32, #tpu.memory_space<vmem>>, vector<256x128xf32>,
    %c0_i32_7 = arith.constant 0 : i32
    %13 = arith.cmpi eq, %arg1, %c0_i32_7 : i32
    %14 = arith.extui %13 : i1 to i32
    %c0_i32_8 = arith.constant 0 : i32
    %15 = arith.cmpi ne, %14, %c0_i32_8 : i32
    scf.if %15 {
      %c0_9 = arith.constant 0 : index
      %c0_10 = arith.constant 0 : index
      %16 = vector.load %arg7[%c0_9, %c0_10] : memref<256x128xf32, #tpu.memory_space<vmem>>, vector<256x128xf32>
      %17 = arith.truncf %16 : vector<256x128xf32> to vector<256x128xbf16>
      %c0_11 = arith.constant 0 : index
      %c0_12 = arith.constant 0 : index
      %18 = vector.load %arg4[%c0_11, %c0_12] : memref<128x128xbf16, #tpu.memory_space<vmem>>, vector<128x128xbf16>
      %cst_13 = arith.constant dense<0.000000e+00> : vector<256x128xf32>
      %19 = tpu.matmul %17, %18, %cst_13 {dimension_numbers = #tpu.dot_dimension_numbers<[1], [0], [0], [1], [0, 0, 1, 1], [], []>} : vector<256x128xbf16>, vector<128x128xbf16>, vector<256x128xf32> -> vector<256x128xf32>
      %c0_14 = arith.constant 0 : index
      %c0_15 = arith.constant 0 : index
      %20 = vector.load %arg5[%c0_14, %c0_15] : memref<1x128xf32, #tpu.memory_space<vmem>>, vector<1x128xf32>
      %21 = vector.broadcast %20 : vector<1x128xf32> to vector<256x128xf32>
      %22 = arith.addf %19, %21 : vector<256x128xf32>
      %cst_16 = arith.constant 0.000000e+00 : f32
      %23 = vector.broadcast %cst_16 : f32 to vector<256x128xf32>
      %24 = arith.maximumf %22, %23 : vector<256x128xf32>
      %c0_17 = arith.constant 0 : index
      %c0_18 = arith.constant 0 : index
      %25 = vector.load %arg6[%c0_17, %c0_18] : memref<256x128xf32, #tpu.memory_space<vmem>>, vector<256x128xf32>
      tpu.vector_store %arg6[%c0_17, %c0_18], %24 {strides = array<i32>} : memref<256x128xf32, #tpu.memory_space<vmem>>, vector<256x128xf32>,
    } else {
    }
    return
  }
  func.func @transform_0(%arg0: i32, %arg1: i32) -> (i32, i32) {
    %c0_i32 = arith.constant 0 : i32
    return %arg0, %arg1 : i32, i32
  }
  func.func @transform_1(%arg0: i32, %arg1: i32) -> (i32, i32) {
    %c0_i32 = arith.constant 0 : i32
    %c0_i32_0 = arith.constant 0 : i32
    %c0_i32_1 = arith.constant 0 : i32
    return %c0_i32, %c0_i32_0 : i32, i32
  }
  func.func @transform_2(%arg0: i32, %arg1: i32) -> (i32, i32) {
    %c0_i32 = arith.constant 0 : i32
    %c0_i32_0 = arith.constant 0 : i32
    %c0_i32_1 = arith.constant 0 : i32
    return %c0_i32, %c0_i32_0 : i32, i32
  }
  func.func @transform_3(%arg0: i32, %arg1: i32) -> (i32, i32) {
    %c0_i32 = arith.constant 0 : i32
    %c0_i32_0 = arith.constant 0 : i32
    %c0_i32_1 = arith.constant 0 : i32
    return %c0_i32, %c0_i32_0 : i32, i32
  }
  func.func @transform_4(%arg0: i32, %arg1: i32) -> (i32, i32) {
    %c0_i32 = arith.constant 0 : i32
    %c0_i32_0 = arith.constant 0 : i32
    return %arg0, %c0_i32 : i32, i32
  }
}

</mosaic_0001>

<bundles_post_ra>
// kernel: tpu_custom_call.1
= control target key start
LH: loop header
LB: loop body
LE: loop exit
PB: predicated region body
PF: predicated region fallthrough
CT: control target
= control target key end

     0   :  { %9 = vsyncpa [#allocation4], 0  ;;  %s1529_s0 = inlined_call_operand.hbm [shape: bf16[256,256], index: 0, kind: input, shape index: {}]   ;;  %s1530_s1 = inlined_call_operand.hbm [shape: f32[256,128], index: 1, kind: input, shape index: {}]   ;;  %s1531_s2 = inlined_call_operand.hbm [shape: bf16[128,128], index: 2, kind: input, shape index: {}]   ;;  %s1532_s3 = inlined_call_operand.vmem [shape: f32[1,128], index: 3, kind: input, shape index: {}]   ;;  %s1533_s4 = inlined_call_operand.hbm [shape: f32[256,128], index: 4, kind: output, shape index: {}]  }
   0x1   :  { %10 = vsyncpa [#allocation7], 0 }
   0x2   :  { %11 = vsyncpa [#allocation5], 0  ;;  %s1359_s15 = smov [#allocation6]   ;;  %s1360_s17 = smov [#allocation3]  }
   0x3   :  { %s29_s16 = sshll.u32 %s1359_s15, 4  ;;  %s17_s18 = sshll.u32 %s1360_s17, 4  ;;  %s30_s16 = int_to_ptr.vmem [resolvable:$true] %s29_s16  ;;  %s1392_s18 = int_to_ptr.vmem [resolvable:$true] %s17_s18 }
   0x4   :  { %s1265_s21 = scalar_lea.hbm %s1530_s1, 4096 }
   0x5   :  { %p1266_p0 = scmp.ne.s32.totalorder %s1530_s1, %s1265_s21  ;;  %p1269_p1 = scmp.lt.u32.totalorder %s1265_s21, %s1530_s1 }
   0x7   :  { %p1271_p2 = pnand %p1269_p1, %p1266_p0 }
   0x9   :  { %1274 = shalt.err (!%p1271_p2)
}
   0xa   :  { %s1275_s26 = scalar_lea.vmem %s30_s16, 4096  ;;  %p1280_p4 = scmp.lt.s32.totalorder %s30_s16, %s30_s16 }
   0xb   :  { %p1276_p3 = scmp.ne.s32.totalorder %s30_s16, %s1275_s26  ;;  %p1281_p5 = scmp.lt.s32.totalorder %s1275_s26, %s1275_s26 }
   0xd   :  { %p1282_p6 = por %p1281_p5, %p1280_p4 }
   0xf   :  { %p1283_p7 = pnand %p1282_p6, %p1276_p3 }
  0x11   :  { %1286 = shalt.err (!%p1283_p7)
}
  0x12   :  { %s1361_s27 = smov 128   ;;  %s1362_s28 = smov 8  }
  0x13   :  { %35 = dma.hbm_to_vmem [thread:$0]  %s1530_s1, 4096, %s30_s16, [#allocation7], %s1361_s27, %s1361_s27, %s1362_s28  }
  0x14   :  { %s1287_s7 = scalar_lea.hbm %s1529_s0, 4096 }
  0x15   :  { %p1288_p8 = scmp.ne.s32.totalorder %s1529_s0, %s1287_s7  ;;  %p1291_p9 = scmp.lt.u32.totalorder %s1287_s7, %s1529_s0 }
  0x17   :  { %p1293_p10 = pnand %p1291_p9, %p1288_p8 }
  0x19   :  { %1296 = shalt.err (!%p1293_p10)
}
  0x1a   :  { %s1297_s12 = scalar_lea.vmem %s1392_s18, 4096  ;;  %p1302_p12 = scmp.lt.s32.totalorder %s1392_s18, %s1392_s18 }
  0x1b   :  { %p1298_p11 = scmp.ne.s32.totalorder %s1392_s18, %s1297_s12  ;;  %p1303_p13 = scmp.lt.s32.totalorder %s1297_s12, %s1297_s12 }
  0x1d   :  { %p1304_p0 = por %p1303_p13, %p1302_p12 }
  0x1f   :  { %p1305_p1 = pnand %p1304_p0, %p1298_p11 }
  0x21   :  { %1308 = shalt.err (!%p1305_p1)
}
  0x22   :  { %23 = dma.hbm_to_vmem [thread:$0]  %s1529_s0, 4096, %s1392_s18, [#allocation4], %s1361_s27, %s1361_s27, %s1362_s28  }
  0x23   :  { %s1363_s14 = smov [#allocation8]   ;;  %s1309_s19 = scalar_lea.hbm %s1531_s2, 1024 }
  0x24   :  { %s41_s15 = sshll.u32 %s1363_s14, 4  ;;  %p1310_p2 = scmp.ne.s32.totalorder %s1531_s2, %s1309_s19  ;;  %s42_s15 = int_to_ptr.vmem [resolvable:$true] %s41_s15 }
  0x25   :  { %p1313_p3 = scmp.lt.u32.totalorder %s1309_s19, %s1531_s2 }
  0x27   :  { %p1315_p4 = pnand %p1313_p3, %p1310_p2 }
  0x29   :  { %1318 = shalt.err (!%p1315_p4)
}
  0x2a   :  { %s1319_s24 = scalar_lea.vmem %s42_s15, 1024  ;;  %p1324_p6 = scmp.lt.s32.totalorder %s42_s15, %s42_s15 }
  0x2b   :  { %p1320_p5 = scmp.ne.s32.totalorder %s42_s15, %s1319_s24  ;;  %p1325_p7 = scmp.lt.s32.totalorder %s1319_s24, %s1319_s24 }
  0x2d   :  { %p1326_p8 = por %p1325_p7, %p1324_p6 }
  0x2f   :  { %p1327_p9 = pnand %p1326_p8, %p1320_p5 }
  0x31   :  { %1330 = shalt.err (!%p1327_p9)
}
  0x32   :  { %s1364_s0 = smov 64   ;;  %s1365_s18 = smov 4  }
  0x33   :  { %47 = dma.hbm_to_vmem [thread:$0]  %s1531_s2, 1024, %s42_s15, [#allocation7], %s1364_s0, %s1364_s0, %s1365_s18  }
  0x34   :  { %1353 = dma.done.wait [#allocation4], 4096  }
  0x35   :  { %1354 = vsyncadd [#allocation4], 4294963200 }
  0x36   :  { %1355 = dma.done.wait [#allocation7], 5120  }
  0x37   :  { %1356 = vsyncadd [#allocation7], 4294962176  ;;  %v114_v0 = vld [vmem:[#allocation6 + $0x80] sm:$0xff]  ;;  %v115_v1 = vld [vmem:[#allocation6 + $0x88] sm:$0xff] }
  0x38   :  { %v98_v2 = vld [vmem:[#allocation6] sm:$0xff]  ;;  %v138_v3 = vpack.c.bf16 %v115_v1, %v114_v0  ;;  %v99_v4 = vld [vmem:[#allocation6 + $0x8] sm:$0xff]  ;;  %v116_v5 = vld [vmem:[#allocation6 + $0x90] sm:$0xff] }
  0x39   :  { %v117_v6 = vld [vmem:[#allocation6 + $0x98] sm:$0xff]  ;;  %v130_v7 = vpack.c.bf16 %v99_v4, %v98_v2  ;;  %v100_v9 = vld [vmem:[#allocation6 + $0x10] sm:$0xff]  ;;  %v118_v11 = vld [vmem:[#allocation6 + $0xa0] sm:$0xff] }
  0x3a   :  { %v139_v8 = vpack.c.bf16 %v117_v6, %v116_v5  ;;  %v101_v10 = vld [vmem:[#allocation6 + $0x18] sm:$0xff]  ;;  %1001 = vmatprep.subr.bf16.mxu0 %v138_v3  ;;  %v119_v12 = vld [vmem:[#allocation6 + $0xa8] sm:$0xff]  ;;  %1185 = vmatprep.subr.bf16.mxu1 %v138_v3  ;;  %v102_v15 = vld [vmem:[#allocation6 + $0x20] sm:$0xff] }
  0x3b   :  { %1002 = vmatpush3.bf16.msra.mxu0 %v130_v7  ;;  %v131_v13 = vpack.c.bf16 %v101_v10, %v100_v9  ;;  %1193 = vmatpush3.bf16.msra.mxu1 %v130_v7  ;;  %v140_v14 = vpack.c.bf16 %v119_v12, %v118_v11  ;;  %v103_v16 = vld [vmem:[#allocation6 + $0x28] sm:$0xff]  ;;  %v120_v17 = vld [vmem:[#allocation6 + $0xb0] sm:$0xff]  ;;  %v121_v18 = vld [vmem:[#allocation6 + $0xb8] sm:$0xff] }
  0x3c   :  { %1003 = vmatprep.subr.bf16.mxu0 %v139_v8  ;;  %1186 = vmatprep.subr.bf16.mxu1 %v139_v8  ;;  %v132_v19 = vpack.c.bf16 %v103_v16, %v102_v15  ;;  %v141_v20 = vpack.c.bf16 %v121_v18, %v120_v17  ;;  %v104_v21 = vld [vmem:[#allocation6 + $0x30] sm:$0xff]  ;;  %v105_v22 = vld [vmem:[#allocation6 + $0x38] sm:$0xff]  ;;  %v122_v23 = vld [vmem:[#allocation6 + $0xc0] sm:$0xff] }
  0x3d   :  { %v123_v24 = vld [vmem:[#allocation6 + $0xc8] sm:$0xff]  ;;  %v133_v26 = vpack.c.bf16 %v105_v22, %v104_v21  ;;  %v106_v27 = vld [vmem:[#allocation6 + $0x40] sm:$0xff]  ;;  %v124_v30 = vld [vmem:[#allocation6 + $0xd0] sm:$0xff] }
  0x3e   :  { %v1211_v25 = vld [vmem:[#allocation3 + $0x4] ss:$8 sps:$4 sm:$0xff]   ;;  %v142_v28 = vpack.c.bf16 %v123_v24, %v122_v23  ;;  %v125_v31 = vld [vmem:[#allocation6 + $0xd8] sm:$0xff]  ;;  %v108_v33 = vld [vmem:[#allocation6 + $0x50] sm:$0xff] }
  0x3f   :  { %1004 = vmatpush3.bf16.msra.mxu0 %v131_v13  ;;  %1194 = vmatpush3.bf16.msra.mxu1 %v131_v13  ;;  %v107_v29 = vld [vmem:[#allocation6 + $0x48] sm:$0xff]  ;;  %v143_v34 = vpack.c.bf16 %v125_v31, %v124_v30  ;;  %v109_v35 = vld [vmem:[#allocation6 + $0x58] sm:$0xff]  ;;  %v126_v36 = vld [vmem:[#allocation6 + $0xe0] sm:$0xff] }
  0x40   :  { %1005 = vmatprep.subr.bf16.mxu0 %v140_v14  ;;  %1187 = vmatprep.subr.bf16.mxu1 %v140_v14  ;;  %v134_v32 = vpack.c.bf16 %v107_v29, %v106_v27  ;;  %v127_v37 = vld [vmem:[#allocation6 + $0xe8] sm:$0xff]  ;;  %v135_v38 = vpack.c.bf16 %v109_v35, %v108_v33  ;;  %v110_v39 = vld [vmem:[#allocation6 + $0x60] sm:$0xff]  ;;  %v128_v42 = vld [vmem:[#allocation6 + $0xf0] sm:$0xff] }
  0x41   :  { %402 = vmatprep.mubr.bf16.mxu0 %v1211_v25  ;;  %v144_v40 = vpack.c.bf16 %v127_v37, %v126_v36  ;;  %v111_v41 = vld [vmem:[#allocation6 + $0x68] sm:$0xff]  ;;  %v129_v43 = vld [vmem:[#allocation6 + $0xf8] sm:$0xff]  ;;  %v112_v44 = vld [vmem:[#allocation6 + $0x70] sm:$0xff] }
  0x42   :  { %v136_v45 = vpack.c.bf16 %v111_v41, %v110_v39  ;;  %v113_v46 = vld [vmem:[#allocation6 + $0x78] sm:$0xff]  ;;  %v145_v47 = vpack.c.bf16 %v129_v43, %v128_v42  ;;  %v1241_v48 = vld [vmem:[#allocation3 + $0xc4] ss:$8 sps:$4 sm:$0xff]   ;;  %v1209_v50 = vld [vmem:[#allocation3] ss:$8 sps:$4 sm:$0xff]  }
  0x43   :  { %1006 = vmatpush3.bf16.msra.mxu0 %v132_v19  ;;  %1195 = vmatpush3.bf16.msra.mxu1 %v132_v19  ;;  %v137_v49 = vpack.c.bf16 %v113_v46, %v112_v44  ;;  %v1212_v51 = vld [vmem:[#allocation3 + $0x14] ss:$8 sps:$4 sm:$0xff]   ;;  %v1239_v52 = vld [vmem:[#allocation3 + $0xc0] ss:$8 sps:$4 sm:$0xff]   ;;  %v1214_v57 = vld [vmem:[#allocation3 + $0x10] ss:$8 sps:$4 sm:$0xff]  }
  0x44   :  { %1007 = vmatprep.subr.bf16.mxu0 %v141_v20  ;;  %1188 = vmatprep.subr.bf16.mxu1 %v141_v20  ;;  %v1245_v53 = vld [vmem:[#allocation3 + $0xd4] ss:$8 sps:$4 sm:$0xff]   ;;  %v1257_v54 = vld [vmem:[#allocation8] sm:$0xff]   ;;  %v1258_v55 = vld [vmem:[#allocation8 + $0x8] sm:$0xff]  }
  0x45   :  { %498 = vmatprep.mubr.bf16.mxu1 %v1241_v48  ;;  %v1259_v56 = vld [vmem:[#allocation8 + $0x10] sm:$0xff]   ;;  %v1215_v59 = vld [vmem:[#allocation3 + $0x24] ss:$8 sps:$4 sm:$0xff]   ;;  %v1260_v61 = vld [vmem:[#allocation8 + $0x18] sm:$0xff]  }
  0x46   :  { %v1247_v58 = vld [vmem:[#allocation3 + $0xd0] ss:$8 sps:$4 sm:$0xff]   ;;  %v1251_v60 = vld [vmem:[#allocation3 + $0xe4] ss:$8 sps:$4 sm:$0xff]   ;;  %v1217_v62 = vld [vmem:[#allocation3 + $0x20] ss:$8 sps:$4 sm:$0xff]  }
  0x47   :  { %1008 = vmatpush3.bf16.msra.mxu0 %v133_v26  ;;  %1196 = vmatpush3.bf16.msra.mxu1 %v133_v26  ;;  %v1253_v63 = vld [vmem:[#allocation3 + $0xe0] ss:$8 sps:$4 sm:$0xff]   ;;  %v1218_v0 = vld [vmem:[#allocation3 + $0x34] ss:$8 sps:$4 sm:$0xff]   ;;  %v1220_v2 = vld [vmem:[#allocation3 + $0x30] ss:$8 sps:$4 sm:$0xff]  }
  0x48   :  { %1009 = vmatprep.subr.bf16.mxu0 %v142_v28  ;;  %1189 = vmatprep.subr.bf16.mxu1 %v142_v28  ;;  %v1254_v1 = vld [vmem:[#allocation3 + $0xf4] ss:$8 sps:$4 sm:$0xff]   ;;  %v1256_v3 = vld [vmem:[#allocation3 + $0xf0] ss:$8 sps:$4 sm:$0xff]   ;;  %v1221_v4 = vld [vmem:[#allocation3 + $0x44] ss:$8 sps:$4 sm:$0xff]  }
  0x49   :  { %v1223_v5 = vld [vmem:[#allocation3 + $0x40] ss:$8 sps:$4 sm:$0xff]   ;;  %v1224_v6 = vld [vmem:[#allocation3 + $0x54] ss:$8 sps:$4 sm:$0xff]   ;;  %v1226_v7 = vld [vmem:[#allocation3 + $0x50] ss:$8 sps:$4 sm:$0xff]  }
  0x4a   :  { %v1227_v8 = vld [vmem:[#allocation3 + $0x64] ss:$8 sps:$4 sm:$0xff]   ;;  %v1229_v9 = vld [vmem:[#allocation3 + $0x60] ss:$8 sps:$4 sm:$0xff]   ;;  %v1230_v10 = vld [vmem:[#allocation3 + $0x74] ss:$8 sps:$4 sm:$0xff]  }
  0x4b   :  { %1010 = vmatpush3.bf16.msra.mxu0 %v134_v32  ;;  %1197 = vmatpush3.bf16.msra.mxu1 %v134_v32  ;;  %v1232_v11 = vld [vmem:[#allocation3 + $0x70] ss:$8 sps:$4 sm:$0xff]   ;;  %v1233_v12 = vld [vmem:[#allocation3 + $0x84] ss:$8 sps:$4 sm:$0xff]   ;;  %v1235_v13 = vld [vmem:[#allocation3 + $0x80] ss:$8 sps:$4 sm:$0xff]  }
  0x4c   :  { %1011 = vmatprep.subr.bf16.mxu0 %v143_v34  ;;  %1190 = vmatprep.subr.bf16.mxu1 %v143_v34  ;;  %v1236_v14 = vld [vmem:[#allocation3 + $0x94] ss:$8 sps:$4 sm:$0xff]   ;;  %v1238_v15 = vld [vmem:[#allocation3 + $0x90] ss:$8 sps:$4 sm:$0xff]   ;;  %v1242_v16 = vld [vmem:[#allocation3 + $0xa4] ss:$8 sps:$4 sm:$0xff]  }
  0x4d   :  { %v1244_v17 = vld [vmem:[#allocation3 + $0xa0] ss:$8 sps:$4 sm:$0xff]   ;;  %v1248_v18 = vld [vmem:[#allocation3 + $0xb4] ss:$8 sps:$4 sm:$0xff]   ;;  %v1250_v20 = vld [vmem:[#allocation3 + $0xb0] ss:$8 sps:$4 sm:$0xff]  }
  0x4e   :  { %v1261_v19 = vld [vmem:[#allocation8 + $0x20] sm:$0xff]   ;;  %v1262_v21 = vld [vmem:[#allocation8 + $0x28] sm:$0xff]   ;;  %v1263_v22 = vld [vmem:[#allocation8 + $0x30] sm:$0xff]  }
  0x4f   :  { %1012 = vmatpush3.bf16.msra.mxu0 %v135_v38  ;;  %1198 = vmatpush3.bf16.msra.mxu1 %v135_v38  ;;  %v1264_v23 = vld [vmem:[#allocation8 + $0x38] sm:$0xff]  }
  0x50   :  { %1013 = vmatprep.subr.bf16.mxu0 %v144_v40  ;;  %1191 = vmatprep.subr.bf16.mxu1 %v144_v40 }
  0x53   :  { %1014 = vmatpush3.bf16.msra.mxu0 %v136_v45  ;;  %1199 = vmatpush3.bf16.msra.mxu1 %v136_v45 }
  0x54   :  { %1015 = vmatprep.subr.bf16.mxu0 %v145_v47  ;;  %1192 = vmatprep.subr.bf16.mxu1 %v145_v47 }
  0x57   :  { %1016 = vmatpush3.bf16.msra.mxu0 %v137_v49  ;;  %1200 = vmatpush3.bf16.msra.mxu1 %v137_v49 }
  0x58   :  { %1137 = vmatprep.subr.bf16.mxu1 %v1257_v54 }
  0x5a   :  { %403 = vmatmul.mubr.bf16.vlgmr.msra.gmra.mrb[0].mxu0 %v1209_v50  ;;  %499 = vmatmul.mubr.bf16.vlgmr.msra.gmra.mrb[0].mxu1 %v1239_v52 }
  0x5b   :  { %410 = vmatprep.mubr.bf16.mxu0 %v1212_v51  ;;  %506 = vmatprep.mubr.bf16.mxu1 %v1245_v53 }
  0x5c   :  { %1138 = vmatpush3.bf16.msra.mxu1 %v1257_v54 }
  0x5d   :  { %1139 = vmatprep.subr.bf16.mxu1 %v1258_v55 }
  0x60   :  { %1140 = vmatpush3.bf16.msra.mxu1 %v1258_v55 }
  0x61   :  { %1141 = vmatprep.subr.bf16.mxu1 %v1259_v56 }
  0x62   :  { %411 = vmatmul.mubr.bf16.gmra.mrb[4].mxu0 %v1214_v57  ;;  %507 = vmatmul.mubr.bf16.gmra.mrb[4].mxu1 %v1247_v58 }
  0x63   :  { %418 = vmatprep.mubr.bf16.mxu0 %v1215_v59  ;;  %514 = vmatprep.mubr.bf16.mxu1 %v1251_v60 }
  0x64   :  { %1142 = vmatpush3.bf16.msra.mxu1 %v1259_v56 }
  0x65   :  { %1143 = vmatprep.subr.bf16.mxu1 %v1260_v61 }
  0x68   :  { %1144 = vmatpush3.bf16.msra.mxu1 %v1260_v61 }
  0x69   :  { %1145 = vmatprep.subr.bf16.mxu1 %v1261_v19 }
  0x6a   :  { %419 = vmatmul.mubr.bf16.gmra.mrb[8].mxu0 %v1217_v62  ;;  %515 = vmatmul.mubr.bf16.gmra.mrb[8].mxu1 %v1253_v63 }
  0x6b   :  { %426 = vmatprep.mubr.bf16.mxu0 %v1218_v0  ;;  %522 = vmatprep.mubr.bf16.mxu1 %v1254_v1 }
  0x6c   :  { %1146 = vmatpush3.bf16.msra.mxu1 %v1261_v19 }
  0x6d   :  { %1147 = vmatprep.subr.bf16.mxu1 %v1262_v21 }
  0x70   :  { %1148 = vmatpush3.bf16.msra.mxu1 %v1262_v21 }
  0x71   :  { %1149 = vmatprep.subr.bf16.mxu1 %v1263_v22 }
  0x72   :  { %427 = vmatmul.mubr.bf16.gmra.mrb[12].mxu0 %v1220_v2  ;;  %523 = vmatmul.mubr.bf16.gmra.mrb[12].mxu1 %v1256_v3 }
  0x73   :  { %434 = vmatprep.mubr.bf16.mxu0 %v1221_v4 }
  0x74   :  { %1150 = vmatpush3.bf16.msra.mxu1 %v1263_v22 }
  0x75   :  { %1151 = vmatprep.subr.bf16.mxu1 %v1264_v23 }
  0x78   :  { %1152 = vmatpush3.bf16.msra.mxu1 %v1264_v23 }
  0x7a   :  { %435 = vmatmul.mubr.bf16.gmra.mrb[16].mxu0 %v1223_v5 }
  0x7b   :  { %442 = vmatprep.mubr.bf16.mxu0 %v1224_v6 }
  0x82   :  { %443 = vmatmul.mubr.bf16.gmra.mrb[20].mxu0 %v1226_v7 }
  0x83   :  { %450 = vmatprep.mubr.bf16.mxu0 %v1227_v8 }
  0x8a   :  { %451 = vmatmul.mubr.bf16.gmra.mrb[24].mxu0 %v1229_v9 }
  0x8b   :  { %458 = vmatprep.mubr.bf16.mxu0 %v1230_v10 }
  0x92   :  { %459 = vmatmul.mubr.bf16.gmra.mrb[28].mxu0 %v1232_v11 }
  0x93   :  { %466 = vmatprep.mubr.bf16.mxu0 %v1233_v12 }
  0x9a   :  { %467 = vmatmul.mubr.bf16.gmra.mrb[32].mxu0 %v1235_v13 }
  0x9b   :  { %474 = vmatprep.mubr.bf16.mxu0 %v1236_v14 }
  0xa2   :  { %475 = vmatmul.mubr.bf16.gmra.mrb[36].mxu0 %v1238_v15 }
  0xa3   :  { %482 = vmatprep.mubr.bf16.mxu0 %v1242_v16 }
  0xaa   :  { %483 = vmatmul.mubr.bf16.gmra.mrb[40].mxu0 %v1244_v17 }
  0xab   :  { %490 = vmatprep.mubr.bf16.mxu0 %v1248_v18 }
  0xb2   :  { %491 = vmatmul.mubr.bf16.gmra.mrb[44].mxu0 %v1250_v20 }
 0x12d   :  { %v1017_v24 = vpop.f32.mrb[0].mxu0  ;;  %v1089_v25 = vpop.f32.mrb[0].mxu1 }
 0x12e   :  { %v1018_v26 = vpop.f32.mrb[1].mxu0  ;;  %v1090_v27 = vpop.f32.mrb[1].mxu1 }
 0x12f   :  { %v1019_v28 = vadd.f32 %v1018_v26, %v1017_v24  ;;  %v1020_v29 = vpop.f32.mrb[2].mxu0  ;;  %v1441_v30 = vadd.f32 %v1090_v27, %v1089_v25  ;;  %v1092_v31 = vpop.f32.mrb[2].mxu1 }
 0x130   :  { %v1021_v32 = vpop.f32.mrb[3].mxu0  ;;  %v1093_v33 = vpop.f32.mrb[3].mxu1 }
 0x131   :  { %v1022_v34 = vadd.f32 %v1021_v32, %v1020_v29  ;;  %v1443_v35 = vadd.f32 %v1093_v33, %v1092_v31 }
 0x133   :  { %v630_v36 = vpack.c.bf16 %v1022_v34, %v1019_v28  ;;  %v642_v37 = vpack.c.bf16 %v1443_v35, %v1441_v30 }
 0x135   :  { %v1023_v38 = vpop.f32.mrb[4].mxu0  ;;  %1153 = vmatprep.mubr.bf16.mxu1 %v630_v36  ;;  %v1095_v39 = vpop.f32.mrb[4].mxu1 }
 0x136   :  { %v1024_v40 = vpop.f32.mrb[5].mxu0  ;;  %v1096_v41 = vpop.f32.mrb[5].mxu1 }
 0x137   :  { %v1025_v42 = vadd.f32 %v1024_v40, %v1023_v38  ;;  %v1026_v43 = vpop.f32.mrb[6].mxu0  ;;  %v1447_v44 = vadd.f32 %v1096_v41, %v1095_v39  ;;  %v1098_v45 = vpop.f32.mrb[6].mxu1 }
 0x138   :  { %v1027_v46 = vpop.f32.mrb[7].mxu0  ;;  %v1099_v47 = vpop.f32.mrb[7].mxu1 }
 0x139   :  { %v1028_v48 = vadd.f32 %v1027_v46, %v1026_v43  ;;  %v1449_v49 = vadd.f32 %v1099_v47, %v1098_v45 }
 0x13b   :  { %v631_v50 = vpack.c.bf16 %v1028_v48, %v1025_v42  ;;  %v643_v51 = vpack.c.bf16 %v1449_v49, %v1447_v44 }
 0x13d   :  { %v1029_v52 = vpop.f32.mrb[8].mxu0  ;;  %1154 = vmatmul.mubr.bf16.vlgmr.msra.gmra.mrb[16].mxu1 %v631_v50  ;;  %v1101_v53 = vpop.f32.mrb[8].mxu1 }
 0x13e   :  { %v1030_v54 = vpop.f32.mrb[9].mxu0  ;;  %v1102_v55 = vpop.f32.mrb[9].mxu1 }
 0x13f   :  { %v1031_v56 = vadd.f32 %v1030_v54, %v1029_v52  ;;  %v1032_v57 = vpop.f32.mrb[10].mxu0  ;;  %v1453_v58 = vadd.f32 %v1102_v55, %v1101_v53  ;;  %v1104_v59 = vpop.f32.mrb[10].mxu1 }
 0x140   :  { %v1033_v60 = vpop.f32.mrb[11].mxu0  ;;  %v1105_v61 = vpop.f32.mrb[11].mxu1 }
 0x141   :  { %v1034_v62 = vadd.f32 %v1033_v60, %v1032_v57  ;;  %v1455_v63 = vadd.f32 %v1105_v61, %v1104_v59 }
 0x143   :  { %v632_v0 = vpack.c.bf16 %v1034_v62, %v1031_v56  ;;  %v644_v1 = vpack.c.bf16 %v1455_v63, %v1453_v58 }
 0x145   :  { %v1035_v2 = vpop.f32.mrb[12].mxu0  ;;  %1157 = vmatprep.mubr.bf16.mxu1 %v632_v0  ;;  %v1107_v3 = vpop.f32.mrb[12].mxu1 }
 0x146   :  { %v1036_v4 = vpop.f32.mrb[13].mxu0  ;;  %v1108_v5 = vpop.f32.mrb[13].mxu1 }
 0x147   :  { %v1037_v6 = vadd.f32 %v1036_v4, %v1035_v2  ;;  %v1038_v7 = vpop.f32.mrb[14].mxu0  ;;  %v1459_v8 = vadd.f32 %v1108_v5, %v1107_v3  ;;  %v1110_v9 = vpop.f32.mrb[14].mxu1 }
 0x148   :  { %v1039_v10 = vpop.f32.mrb[15].mxu0  ;;  %v1111_v11 = vpop.f32.mrb[15].mxu1 }
 0x149   :  { %v1040_v12 = vadd.f32 %v1039_v10, %v1038_v7  ;;  %v1461_v13 = vadd.f32 %v1111_v11, %v1110_v9 }
 0x14b   :  { %v633_v14 = vpack.c.bf16 %v1040_v12, %v1037_v6  ;;  %v645_v15 = vpack.c.bf16 %v1461_v13, %v1459_v8 }
 0x14d   :  { %v1041_v16 = vpop.f32.mrb[16].mxu0  ;;  %1158 = vmatmul.mubr.bf16.gmra.mrb[20].mxu1 %v633_v14 }
 0x14e   :  { %v1042_v17 = vpop.f32.mrb[17].mxu0 }
 0x14f   :  { %v1043_v18 = vadd.f32 %v1042_v17, %v1041_v16  ;;  %v1044_v19 = vpop.f32.mrb[18].mxu0 }
 0x150   :  { %v1045_v20 = vpop.f32.mrb[19].mxu0 }
 0x151   :  { %v1046_v21 = vadd.f32 %v1045_v20, %v1044_v19  ;;  %v1480_v20 = vld [vmem:[%s1532_s3] ss:$0 sm:$0xff]  ;;  %s1366_s3 = smov [#allocation9]  }
 0x152   :  { %s947_s30 = sshll.u32 %s1366_s3, 4  ;;  %s948_s30 = int_to_ptr.vmem [resolvable:$true] %s947_s30 }
 0x153   :  { %v634_v22 = vpack.c.bf16 %v1046_v21, %v1043_v18  ;;  %s1331_s5 = scalar_lea.vmem %s948_s30, 4096  ;;  %p1336_p11 = scmp.lt.s32.totalorder %s948_s30, %s948_s30 }
 0x154   :  { %p1332_p10 = scmp.ne.s32.totalorder %s948_s30, %s1331_s5  ;;  %p1337_p12 = scmp.lt.s32.totalorder %s1331_s5, %s1331_s5 }
 0x155   :  { %v1047_v23 = vpop.f32.mrb[20].mxu0  ;;  %1161 = vmatprep.mubr.bf16.mxu1 %v634_v22 }
 0x156   :  { %v1048_v24 = vpop.f32.mrb[21].mxu0  ;;  %p1338_p13 = por %p1337_p12, %p1336_p11 }
 0x157   :  { %v1049_v25 = vadd.f32 %v1048_v24, %v1047_v23  ;;  %v1050_v26 = vpop.f32.mrb[22].mxu0 }
 0x158   :  { %v1051_v27 = vpop.f32.mrb[23].mxu0  ;;  %p1339_p0 = pnand %p1338_p13, %p1332_p10 }
 0x159   :  { %v1052_v28 = vadd.f32 %v1051_v27, %v1050_v26 }
 0x15b   :  { %v635_v29 = vpack.c.bf16 %v1052_v28, %v1049_v25 }
 0x15d   :  { %v1053_v31 = vpop.f32.mrb[24].mxu0  ;;  %1162 = vmatmul.mubr.bf16.gmra.mrb[24].mxu1 %v635_v29 }
 0x15e   :  { %v1054_v32 = vpop.f32.mrb[25].mxu0 }
 0x15f   :  { %v1055_v33 = vadd.f32 %v1054_v32, %v1053_v31  ;;  %v1056_v34 = vpop.f32.mrb[26].mxu0 }
 0x160   :  { %v1057_v36 = vpop.f32.mrb[27].mxu0 }
 0x161   :  { %v1058_v38 = vadd.f32 %v1057_v36, %v1056_v34 }
 0x163   :  { %v636_v39 = vpack.c.bf16 %v1058_v38, %v1055_v33 }
 0x165   :  { %v1059_v40 = vpop.f32.mrb[28].mxu0  ;;  %1165 = vmatprep.mubr.bf16.mxu1 %v636_v39 }
 0x166   :  { %v1060_v41 = vpop.f32.mrb[29].mxu0 }
 0x167   :  { %v1061_v42 = vadd.f32 %v1060_v41, %v1059_v40  ;;  %v1062_v43 = vpop.f32.mrb[30].mxu0 }
 0x168   :  { %v1063_v45 = vpop.f32.mrb[31].mxu0 }
 0x169   :  { %v1064_v46 = vadd.f32 %v1063_v45, %v1062_v43 }
 0x16b   :  { %v637_v47 = vpack.c.bf16 %v1064_v46, %v1061_v42 }
 0x16d   :  { %v1065_v48 = vpop.f32.mrb[32].mxu0  ;;  %1166 = vmatmul.mubr.bf16.gmra.mrb[28].mxu1 %v637_v47 }
 0x16e   :  { %v1066_v50 = vpop.f32.mrb[33].mxu0 }
 0x16f   :  { %v1067_v52 = vadd.f32 %v1066_v50, %v1065_v48  ;;  %v1068_v53 = vpop.f32.mrb[34].mxu0 }
 0x170   :  { %v1069_v54 = vpop.f32.mrb[35].mxu0 }
 0x171   :  { %v1070_v55 = vadd.f32 %v1069_v54, %v1068_v53 }
 0x173   :  { %v638_v56 = vpack.c.bf16 %v1070_v55, %v1067_v52 }
 0x175   :  { %v1071_v57 = vpop.f32.mrb[36].mxu0  ;;  %1169 = vmatprep.mubr.bf16.mxu1 %v638_v56 }
 0x176   :  { %v1072_v59 = vpop.f32.mrb[37].mxu0 }
 0x177   :  { %v1073_v60 = vadd.f32 %v1072_v59, %v1071_v57  ;;  %v1074_v61 = vpop.f32.mrb[38].mxu0 }
 0x178   :  { %v1075_v62 = vpop.f32.mrb[39].mxu0 }
 0x179   :  { %v1076_v0 = vadd.f32 %v1075_v62, %v1074_v61 }
 0x17b   :  { %v639_v2 = vpack.c.bf16 %v1076_v0, %v1073_v60 }
 0x17d   :  { %v1077_v3 = vpop.f32.mrb[40].mxu0  ;;  %1170 = vmatmul.mubr.bf16.gmra.mrb[32].mxu1 %v639_v2 }
 0x17e   :  { %v1078_v4 = vpop.f32.mrb[41].mxu0 }
 0x17f   :  { %v1079_v5 = vadd.f32 %v1078_v4, %v1077_v3  ;;  %v1080_v6 = vpop.f32.mrb[42].mxu0 }
 0x180   :  { %v1081_v7 = vpop.f32.mrb[43].mxu0 }
 0x181   :  { %v1082_v9 = vadd.f32 %v1081_v7, %v1080_v6 }
 0x183   :  { %v640_v10 = vpack.c.bf16 %v1082_v9, %v1079_v5 }
 0x185   :  { %v1083_v11 = vpop.f32.mrb[44].mxu0  ;;  %1173 = vmatprep.mubr.bf16.mxu1 %v640_v10 }
 0x186   :  { %v1084_v12 = vpop.f32.mrb[45].mxu0 }
 0x187   :  { %v1085_v14 = vadd.f32 %v1084_v12, %v1083_v11  ;;  %v1086_v16 = vpop.f32.mrb[46].mxu0 }
 0x188   :  { %v1087_v17 = vpop.f32.mrb[47].mxu0 }
 0x189   :  { %v1088_v18 = vadd.f32 %v1087_v17, %v1086_v16 }
 0x18b   :  { %v641_v19 = vpack.c.bf16 %v1088_v18, %v1085_v14 }
 0x18d   :  { %1174 = vmatmul.mubr.bf16.gmra.mrb[36].mxu1 %v641_v19 }
 0x18e   :  { %1177 = vmatprep.mubr.bf16.mxu1 %v642_v37 }
 0x195   :  { %1178 = vmatmul.mubr.bf16.gmra.mrb[40].mxu1 %v643_v51 }
 0x196   :  { %1181 = vmatprep.mubr.bf16.mxu1 %v644_v1 }
 0x19d   :  { %1182 = vmatmul.mubr.bf16.gmra.mrb[44].mxu1 %v645_v15 }
 0x210   :  { %v1155_v21 = vpop.f32.mrb[16].mxu1 }
 0x211   :  { %v760_v30 = vadd.f32 %v1155_v21, %v1480_v20  ;;  %v751_v35 = vpop.f32.mrb[17].mxu1 }
 0x212   :  { %v752_v37 = vadd.f32 %v1480_v20, %v751_v35  ;;  %v1156_v44 = vpop.f32.mrb[18].mxu1 }
 0x213   :  { %v880_v49 = vmax.f32 %v760_v30, 0.0  ;;  %v763_v51 = vadd.f32 %v1156_v44, %v1480_v20  ;;  %v754_v58 = vpop.f32.mrb[19].mxu1 }
 0x214   :  { %v878_v63 = vmax.f32 %v752_v37, 0.0  ;;  %v755_v1 = vadd.f32 %v1480_v20, %v754_v58 }
 0x215   :  { %912 = vst [vmem:[#allocation9 + $0x10] sm:$0xff] %v880_v49  ;;  %v881_v8 = vmax.f32 %v763_v51, 0.0 }
 0x216   :  { %910 = vst [vmem:[#allocation9] sm:$0xff] %v878_v63  ;;  %v879_v13 = vmax.f32 %v755_v1, 0.0 }
 0x217   :  { %913 = vst [vmem:[#allocation9 + $0x18] sm:$0xff] %v881_v8 }
 0x218   :  { %911 = vst [vmem:[#allocation9 + $0x8] sm:$0xff] %v879_v13 }
 0x220   :  { %v1159_v15 = vpop.f32.mrb[20].mxu1 }
 0x221   :  { %v776_v22 = vadd.f32 %v1159_v15, %v1480_v20  ;;  %v767_v23 = vpop.f32.mrb[21].mxu1 }
 0x222   :  { %v768_v24 = vadd.f32 %v1480_v20, %v767_v23  ;;  %v1160_v25 = vpop.f32.mrb[22].mxu1 }
 0x223   :  { %v884_v26 = vmax.f32 %v776_v22, 0.0  ;;  %v779_v27 = vadd.f32 %v1160_v25, %v1480_v20  ;;  %v770_v28 = vpop.f32.mrb[23].mxu1 }
 0x224   :  { %v882_v29 = vmax.f32 %v768_v24, 0.0  ;;  %v771_v31 = vadd.f32 %v1480_v20, %v770_v28 }
 0x225   :  { %916 = vst [vmem:[#allocation9 + $0x30] sm:$0xff] %v884_v26  ;;  %v885_v32 = vmax.f32 %v779_v27, 0.0 }
 0x226   :  { %914 = vst [vmem:[#allocation9 + $0x20] sm:$0xff] %v882_v29  ;;  %v883_v33 = vmax.f32 %v771_v31, 0.0 }
 0x227   :  { %917 = vst [vmem:[#allocation9 + $0x38] sm:$0xff] %v885_v32 }
 0x228   :  { %915 = vst [vmem:[#allocation9 + $0x28] sm:$0xff] %v883_v33 }
 0x230   :  { %v1163_v34 = vpop.f32.mrb[24].mxu1 }
 0x231   :  { %v792_v36 = vadd.f32 %v1163_v34, %v1480_v20  ;;  %v783_v38 = vpop.f32.mrb[25].mxu1 }
 0x232   :  { %v784_v39 = vadd.f32 %v1480_v20, %v783_v38  ;;  %v1164_v40 = vpop.f32.mrb[26].mxu1 }
 0x233   :  { %v888_v41 = vmax.f32 %v792_v36, 0.0  ;;  %v795_v42 = vadd.f32 %v1164_v40, %v1480_v20  ;;  %v786_v43 = vpop.f32.mrb[27].mxu1 }
 0x234   :  { %v886_v45 = vmax.f32 %v784_v39, 0.0  ;;  %v787_v46 = vadd.f32 %v1480_v20, %v786_v43 }
 0x235   :  { %920 = vst [vmem:[#allocation9 + $0x50] sm:$0xff] %v888_v41  ;;  %v889_v47 = vmax.f32 %v795_v42, 0.0 }
 0x236   :  { %918 = vst [vmem:[#allocation9 + $0x40] sm:$0xff] %v886_v45  ;;  %v887_v48 = vmax.f32 %v787_v46, 0.0 }
 0x237   :  { %921 = vst [vmem:[#allocation9 + $0x58] sm:$0xff] %v889_v47 }
 0x238   :  { %919 = vst [vmem:[#allocation9 + $0x48] sm:$0xff] %v887_v48 }
 0x240   :  { %v1167_v50 = vpop.f32.mrb[28].mxu1 }
 0x241   :  { %v808_v52 = vadd.f32 %v1167_v50, %v1480_v20  ;;  %v799_v53 = vpop.f32.mrb[29].mxu1 }
 0x242   :  { %v800_v54 = vadd.f32 %v1480_v20, %v799_v53  ;;  %v1168_v55 = vpop.f32.mrb[30].mxu1 }
 0x243   :  { %v892_v56 = vmax.f32 %v808_v52, 0.0  ;;  %v811_v57 = vadd.f32 %v1168_v55, %v1480_v20  ;;  %v802_v59 = vpop.f32.mrb[31].mxu1 }
 0x244   :  { %v890_v60 = vmax.f32 %v800_v54, 0.0  ;;  %v803_v61 = vadd.f32 %v1480_v20, %v802_v59 }
 0x245   :  { %924 = vst [vmem:[#allocation9 + $0x70] sm:$0xff] %v892_v56  ;;  %v893_v62 = vmax.f32 %v811_v57, 0.0 }
 0x246   :  { %922 = vst [vmem:[#allocation9 + $0x60] sm:$0xff] %v890_v60  ;;  %v891_v0 = vmax.f32 %v803_v61, 0.0 }
 0x247   :  { %925 = vst [vmem:[#allocation9 + $0x78] sm:$0xff] %v893_v62 }
 0x248   :  { %923 = vst [vmem:[#allocation9 + $0x68] sm:$0xff] %v891_v0 }
 0x250   :  { %v1171_v2 = vpop.f32.mrb[32].mxu1 }
 0x251   :  { %v824_v3 = vadd.f32 %v1171_v2, %v1480_v20  ;;  %v815_v4 = vpop.f32.mrb[33].mxu1 }
 0x252   :  { %v816_v5 = vadd.f32 %v1480_v20, %v815_v4  ;;  %v1172_v6 = vpop.f32.mrb[34].mxu1 }
 0x253   :  { %v896_v7 = vmax.f32 %v824_v3, 0.0  ;;  %v827_v9 = vadd.f32 %v1172_v6, %v1480_v20  ;;  %v818_v10 = vpop.f32.mrb[35].mxu1 }
 0x254   :  { %v894_v11 = vmax.f32 %v816_v5, 0.0  ;;  %v819_v12 = vadd.f32 %v1480_v20, %v818_v10 }
 0x255   :  { %928 = vst [vmem:[#allocation9 + $0x90] sm:$0xff] %v896_v7  ;;  %v897_v14 = vmax.f32 %v827_v9, 0.0 }
 0x256   :  { %926 = vst [vmem:[#allocation9 + $0x80] sm:$0xff] %v894_v11  ;;  %v895_v16 = vmax.f32 %v819_v12, 0.0 }
 0x257   :  { %929 = vst [vmem:[#allocation9 + $0x98] sm:$0xff] %v897_v14 }
 0x258   :  { %927 = vst [vmem:[#allocation9 + $0x88] sm:$0xff] %v895_v16 }
 0x260   :  { %v1175_v17 = vpop.f32.mrb[36].mxu1 }
 0x261   :  { %v840_v18 = vadd.f32 %v1175_v17, %v1480_v20  ;;  %v831_v19 = vpop.f32.mrb[37].mxu1 }
 0x262   :  { %v832_v21 = vadd.f32 %v1480_v20, %v831_v19  ;;  %v1176_v30 = vpop.f32.mrb[38].mxu1 }
 0x263   :  { %v900_v35 = vmax.f32 %v840_v18, 0.0  ;;  %v843_v37 = vadd.f32 %v1176_v30, %v1480_v20  ;;  %v834_v44 = vpop.f32.mrb[39].mxu1 }
 0x264   :  { %v898_v49 = vmax.f32 %v832_v21, 0.0  ;;  %v835_v51 = vadd.f32 %v1480_v20, %v834_v44 }
 0x265   :  { %932 = vst [vmem:[#allocation9 + $0xb0] sm:$0xff] %v900_v35  ;;  %v901_v58 = vmax.f32 %v843_v37, 0.0 }
 0x266   :  { %930 = vst [vmem:[#allocation9 + $0xa0] sm:$0xff] %v898_v49  ;;  %v899_v63 = vmax.f32 %v835_v51, 0.0 }
 0x267   :  { %933 = vst [vmem:[#allocation9 + $0xb8] sm:$0xff] %v901_v58 }
 0x268   :  { %931 = vst [vmem:[#allocation9 + $0xa8] sm:$0xff] %v899_v63  ;;  %v1179_v1 = vpop.f32.mrb[40].mxu1 }
 0x269   :  { %v856_v8 = vadd.f32 %v1179_v1, %v1480_v20  ;;  %v847_v13 = vpop.f32.mrb[41].mxu1 }
 0x26a   :  { %v848_v15 = vadd.f32 %v1480_v20, %v847_v13  ;;  %v1180_v22 = vpop.f32.mrb[42].mxu1 }
 0x26b   :  { %v904_v23 = vmax.f32 %v856_v8, 0.0  ;;  %v859_v24 = vadd.f32 %v1180_v22, %v1480_v20  ;;  %v850_v25 = vpop.f32.mrb[43].mxu1 }
 0x26c   :  { %v902_v26 = vmax.f32 %v848_v15, 0.0  ;;  %v851_v27 = vadd.f32 %v1480_v20, %v850_v25 }
 0x26d   :  { %936 = vst [vmem:[#allocation9 + $0xd0] sm:$0xff] %v904_v23  ;;  %v905_v28 = vmax.f32 %v859_v24, 0.0 }
 0x26e   :  { %934 = vst [vmem:[#allocation9 + $0xc0] sm:$0xff] %v902_v26  ;;  %v903_v29 = vmax.f32 %v851_v27, 0.0 }
 0x26f   :  { %937 = vst [vmem:[#allocation9 + $0xd8] sm:$0xff] %v905_v28 }
 0x270   :  { %935 = vst [vmem:[#allocation9 + $0xc8] sm:$0xff] %v903_v29  ;;  %v1183_v31 = vpop.f32.mrb[44].mxu1 }
 0x271   :  { %v872_v32 = vadd.f32 %v1183_v31, %v1480_v20  ;;  %v863_v33 = vpop.f32.mrb[45].mxu1 }
 0x272   :  { %v864_v34 = vadd.f32 %v1480_v20, %v863_v33  ;;  %v1184_v36 = vpop.f32.mrb[46].mxu1 }
 0x273   :  { %v908_v38 = vmax.f32 %v872_v32, 0.0  ;;  %v875_v39 = vadd.f32 %v1184_v36, %v1480_v20  ;;  %v866_v40 = vpop.f32.mrb[47].mxu1 }
 0x274   :  { %v906_v41 = vmax.f32 %v864_v34, 0.0  ;;  %v867_v42 = vadd.f32 %v1480_v20, %v866_v40 }
 0x275   :  { %940 = vst [vmem:[#allocation9 + $0xf0] sm:$0xff] %v908_v38  ;;  %v909_v43 = vmax.f32 %v875_v39, 0.0 }
 0x276   :  { %938 = vst [vmem:[#allocation9 + $0xe0] sm:$0xff] %v906_v41  ;;  %v907_v45 = vmax.f32 %v867_v42, 0.0 }
 0x277   :  { %941 = vst [vmem:[#allocation9 + $0xf8] sm:$0xff] %v909_v43 }
 0x278   :  { %939 = vst [vmem:[#allocation9 + $0xe8] sm:$0xff] %v907_v45 }
 0x279   :  { %1342 = shalt.err (!%p1339_p0)
}
 0x27a   :  { %s1343_s8 = scalar_lea.hbm %s1533_s4, 4096 }
 0x27b   :  { %p1344_p1 = scmp.ne.s32.totalorder %s1533_s4, %s1343_s8  ;;  %p1347_p2 = scmp.lt.u32.totalorder %s1343_s8, %s1533_s4 }
 0x27d   :  { %p1349_p3 = pnand %p1347_p2, %p1344_p1 }
 0x27f   :  { %1352 = shalt.err (!%p1349_p3)
}
 0x280   :  { %953 = dma.vmem_to_hbm [thread:$0]  %s948_s30, 4096, %s1533_s4, [#allocation5], %s1361_s27, %s1361_s27, %s1362_s28  }
 0x281   :  { %1357 = dma.done.wait [#allocation5], 4096  }
 0x282   :  { %1358 = vsyncadd [#allocation5], 4294963200 }
 0x283   :  { %957 = vsyncpa [#allocation4], 1 }
 0x284   :  { %958 = vsyncpa [#allocation7], 1 }
 0x285   :  { %959 = vsyncpa [#allocation5], 1 }

</bundles_post_ra>
